<compile_context>
chip_gen: v7x
topology: tpu7x:2x2x1
jax: 0.10.0
libtpu: 0.0.40
codegen_flags: <defaults>
</compile_context>

<pallas_src>
import functools

import jax
import jax.numpy as jnp
from jax import lax
from jax.experimental import pallas as pl
from jax.experimental.pallas import tpu as pltpu


# ---------------------------------------------------------------------------
# Kernels
# ---------------------------------------------------------------------------

def _se_resident_kernel(x_ref, w1_ref, b1_ref, w2_ref, b2_ref, o_ref, *, channels_last):
    """Single-pass SE: TB whole images resident in VMEM.

    x_ref/o_ref block: (TB, HW, C) if channels_last else (TB, C, HW).
    """
    x = x_ref[...]
    spatial_axis = -2 if channels_last else -1
    # AdaptiveAvgPool2d(1): global mean over the spatial axis, accumulated in f32.
    pooled = jnp.mean(x, axis=spatial_axis, dtype=jnp.float32)              # (TB, C)
    # 1x1 conv (C -> ns, bias) + Swish
    z1 = jnp.dot(pooled, w1_ref[...], preferred_element_type=jnp.float32) + b1_ref[...]
    h = z1 * jax.nn.sigmoid(z1)
    # 1x1 conv (ns -> C, bias) + Sigmoid gate
    z2 = jnp.dot(h, w2_ref[...], preferred_element_type=jnp.float32) + b2_ref[...]
    scale = jax.nn.sigmoid(z2).astype(x.dtype)                              # (TB, C)
    if channels_last:
        o_ref[...] = (x * scale[:, None, :]).astype(o_ref.dtype)
    else:
        o_ref[...] = (x * scale[:, :, None]).astype(o_ref.dtype)


def _se_pool_scale_kernel(x_ref, w1_ref, b1_ref, w2_ref, b2_ref, scale_ref, acc_ref, *,
                          hw_total, hw_tile, channels_last):
    """Fallback pass 1: spatially tiled pooled mean -> per-image gate scales (f32)."""
    hi = pl.program_id(1)

    @pl.when(hi == 0)
    def _init():
        acc_ref[...] = jnp.zeros_like(acc_ref)

    x = x_ref[...]                                     # (1, th, C) or (1, C, th)
    spatial_axis = 1 if channels_last else 2
    if hw_total % hw_tile != 0:
        # Mask the out-of-range tail of the last (partial) spatial block.
        pos = hi * hw_tile + lax.broadcasted_iota(jnp.int32, x.shape, spatial_axis)
        x = jnp.where(pos < hw_total, x, jnp.zeros_like(x))
    acc_ref[...] += jnp.sum(x, axis=spatial_axis, dtype=jnp.float32)        # (1, C)

    @pl.when(hi == pl.num_programs(1) - 1)
    def _finalize():
        pooled = acc_ref[...] * (1.0 / float(hw_total))
        z1 = jnp.dot(pooled, w1_ref[...], preferred_element_type=jnp.float32) + b1_ref[...]
        h = z1 * jax.nn.sigmoid(z1)
        z2 = jnp.dot(h, w2_ref[...], preferred_element_type=jnp.float32) + b2_ref[...]
        scale_ref[...] = jax.nn.sigmoid(z2)[:, None, :]                     # (1, 1, C)


def _se_gate_kernel(x_ref, scale_ref, o_ref):
    """Fallback pass 2: spatially tiled gate  y = x * scale (scale pre-shaped to broadcast)."""
    x = x_ref[...]
    o_ref[...] = (x * scale_ref[...].astype(x.dtype)).astype(o_ref.dtype)


# ---------------------------------------------------------------------------
# Sizing helpers
# ---------------------------------------------------------------------------

def _round_up(a, b):
    return ((a + b - 1) // b) * b


def _cdiv(a, b):
    return (a + b - 1) // b


def _vmem_capacity_bytes(default=64 << 20):
    """Per-TensorCore VMEM capacity; conservative default fits every generation."""
    try:
        cap = getattr(pltpu.get_tpu_info(), "vmem_capacity_bytes", None)
        if cap:
            return int(cap)
    except Exception:
        pass
    return default


def _choose_batch_tile(n, per_image_block_bytes, target_tile_bytes, vmem_budget_bytes,
                       min_total_steps=8):
    """Images per grid step for the resident path.

    Caps by (a) VMEM budget (in + out, double-buffered => ~4x the tile),
    (b) the per-generation target tile size, and (c) keeping >= 8 total grid
    steps (>= 4 per TensorCore on v7x megacore) so prologue/epilogue DMAs are
    hidden by the software pipeline.
    """
    by_vmem = max(1, vmem_budget_bytes // (4 * per_image_block_bytes))
    by_target = max(1, target_tile_bytes // per_image_block_bytes)
    desired_steps = min(n, min_total_steps)
    by_steps = max(1, n // desired_steps)
    return max(1, min(by_vmem, by_target, by_steps, n))


# ---------------------------------------------------------------------------
# Wrapper
# ---------------------------------------------------------------------------

def squeeze_excite(x, w1, b1, w2, b2, *, target_tile_bytes=None, force_two_pass=False):
    """x: (N, C, H, W); w1: (C, ns); b1: (1, ns); w2: (ns, C); b2: (1, C)."""
    N, C, H, W = x.shape
    HW = H * W
    ns = w1.shape[1]
    itemsize = x.dtype.itemsize
    sub = max(8, 32 // itemsize)          # sublane pack: 8 (f32), 16 (bf16), 32 (int8)

    # ---- generation-aware sizing -------------------------------------------
    vmem_cap = _vmem_capacity_bytes()
    vmem_limit = max(16 << 20, vmem_cap - (12 << 20))     # ~52 MiB v7x, ~116 MiB v5e/v6e
    if target_tile_bytes is None:
        target_tile_bytes = (8 << 20) if vmem_cap >= (96 << 20) else (4 << 20)
    weights_bytes = 4 * int(w1.size + b1.size + w2.size + b2.size)
    vmem_budget = max(4 << 20, vmem_limit - weights_bytes - (2 << 20))

    # ---- layout: lanes get the larger of {C, HW} (lane-dense loads/stores) --
    bytes_hw_lanes = _round_up(C, sub) * _round_up(HW, 128) * itemsize   # (.., C, HW)
    bytes_c_lanes = _round_up(HW, sub) * _round_up(C, 128) * itemsize    # (.., HW, C)
    channels_last = bytes_c_lanes < bytes_hw_lanes
    if channels_last:
        x2 = jnp.transpose(x.reshape(N, C, HW), (0, 2, 1))   # (N, HW, C)
        per_image_block_bytes = bytes_c_lanes
    else:
        x2 = x.reshape(N, C, HW)                              # (N, C, HW)
        per_image_block_bytes = bytes_hw_lanes

    resident_fits = 4 * per_image_block_bytes <= vmem_budget

    if resident_fits and not force_two_pass:
        # ------------------ fast path: one pass over x -----------------------
        tb = _choose_batch_tile(N, per_image_block_bytes, target_tile_bytes, vmem_budget)
        n_pad = _cdiv(N, tb) * tb
        if n_pad != N:   # non-divisor batch: zero-pad (pooled(0)=0 -> finite gate)
            x2 = jnp.pad(x2, ((0, n_pad - N),) + ((0, 0),) * (x2.ndim - 1))
        grid = (n_pad // tb,)
        block = (tb, HW, C) if channels_last else (tb, C, HW)

        # NOTE: input_output_aliases={0: 0} would save an HBM buffer when the
        # caller no longer needs x; left off since the caller here reuses x.
        out2 = pl.pallas_call(
            functools.partial(_se_resident_kernel, channels_last=channels_last),
            out_shape=jax.ShapeDtypeStruct(x2.shape, x.dtype),
            grid=grid,
            in_specs=[
                pl.BlockSpec(block, lambda n: (n, 0, 0)),
                pl.BlockSpec((C, ns), lambda n: (0, 0)),
                pl.BlockSpec((1, ns), lambda n: (0, 0)),
                pl.BlockSpec((ns, C), lambda n: (0, 0)),
                pl.BlockSpec((1, C), lambda n: (0, 0)),
            ],
            out_specs=pl.BlockSpec(block, lambda n: (n, 0, 0)),
            compiler_params=pltpu.CompilerParams(
                dimension_semantics=("parallel",),
                vmem_limit_bytes=int(vmem_limit),
            ),
            cost_estimate=pl.CostEstimate(
                flops=2 * N * C * HW + 4 * N * C * ns,
                transcendentals=N * (2 * ns + C),
                bytes_accessed=2 * N * C * HW * itemsize,
            ),
        )(x2, w1, b1, w2, b2)
        out2 = out2[:N]
    else:
        # -------- fallback: pooled/scale pass + spatially tiled gate pass ----
        # 1.5x HBM traffic; only used when one image cannot stay resident.
        if channels_last:
            th_unit = sub                                     # spatial on sublanes
            unit_bytes = th_unit * _round_up(C, 128) * itemsize
        else:
            th_unit = 128                                     # spatial on lanes
            unit_bytes = _round_up(C, sub) * th_unit * itemsize
        max_units = _cdiv(HW, th_unit)
        units = max(1, min(vmem_budget // (4 * unit_bytes),
                           max(1, target_tile_bytes // unit_bytes),
                           max_units))
        if units >= max_units:
            th, hw_blocks = HW, 1            # single spatial block: use full extent
        else:
            th = units * th_unit
            hw_blocks = _cdiv(HW, th)

        if channels_last:
            x_block, x_index = (1, th, C), (lambda n, h: (n, h, 0))
        else:
            x_block, x_index = (1, C, th), (lambda n, h: (n, 0, h))

        scale = pl.pallas_call(
            functools.partial(_se_pool_scale_kernel, hw_total=HW, hw_tile=th,
                              channels_last=channels_last),
            out_shape=jax.ShapeDtypeStruct((N, 1, C), jnp.float32),
            grid=(N, hw_blocks),
            in_specs=[
                pl.BlockSpec(x_block, x_index),
                pl.BlockSpec((C, ns), lambda n, h: (0, 0)),
                pl.BlockSpec((1, ns), lambda n, h: (0, 0)),
                pl.BlockSpec((ns, C), lambda n, h: (0, 0)),
                pl.BlockSpec((1, C), lambda n, h: (0, 0)),
            ],
            out_specs=pl.BlockSpec((1, 1, C), lambda n, h: (n, 0, 0)),
            scratch_shapes=[pltpu.VMEM((1, C), jnp.float32)],
            compiler_params=pltpu.CompilerParams(
                dimension_semantics=("parallel", "arbitrary"),
                vmem_limit_bytes=int(vmem_limit),
            ),
            cost_estimate=pl.CostEstimate(
                flops=N * C * HW + 4 * N * C * ns,
                transcendentals=N * (2 * ns + C),
                bytes_accessed=N * C * HW * itemsize,
            ),
        )(x2, w1, b1, w2, b2)

        # Pre-shape the (tiny) scale array so it broadcasts directly in-kernel.
        if channels_last:
            scale_b, s_block = scale, (1, 1, C)                       # (N, 1, C)
        else:
            scale_b, s_block = jnp.transpose(scale, (0, 2, 1)), (1, C, 1)  # (N, C, 1)

        out2 = pl.pallas_call(
            _se_gate_kernel,
            out_shape=jax.ShapeDtypeStruct(x2.shape, x.dtype),
            grid=(N, hw_blocks),
            in_specs=[
                pl.BlockSpec(x_block, x_index),
                pl.BlockSpec(s_block, lambda n, h: (n, 0, 0)),
            ],
            out_specs=pl.BlockSpec(x_block, x_index),
            compiler_params=pltpu.CompilerParams(
                dimension_semantics=("parallel", "parallel"),
                vmem_limit_bytes=int(vmem_limit),
            ),
            cost_estimate=pl.CostEstimate(
                flops=N * C * HW,
                transcendentals=0,
                bytes_accessed=2 * N * C * HW * itemsize,
            ),
        )(x2, scale_b)

    if channels_last:
        return jnp.transpose(out2, (0, 2, 1)).reshape(N, C, H, W)
    return out2.reshape(N, C, H, W)


def squeeze_excite_ref(x, w1, b1, w2, b2):
    """Pure-JAX reference for correctness checking."""
    pooled = jnp.mean(x.astype(jnp.float32), axis=(2, 3))  # (N, C)
    z1 = pooled @ w1 + b1
    h = z1 * jax.nn.sigmoid(z1)                            # Swish
    z2 = h @ w2 + b2
    scale = jax.nn.sigmoid(z2)                             # (N, C)
    return (x * scale[:, :, None, None].astype(x.dtype)).astype(x.dtype)


if __name__ == "__main__":
    keys = jax.random.split(jax.random.PRNGKey(0), 10)

    # --- Test 1: SqueezeEx(ni=4, ns=2) at small spatial size (fast path) -----
    N, C, H, W, ns = 2, 4, 16, 16, 2
    x = jax.random.normal(keys[0], (N, C, H, W), dtype=jnp.float32)
    # PyTorch conv1 weight (ns, ni, 1, 1) -> w1 = (ni, ns); conv2 (ni, ns, 1, 1) -> w2 = (ns, ni)
    w1 = 0.1 * jax.random.normal(keys[1], (C, ns), dtype=jnp.float32)
    b1 = 0.1 * jax.random.normal(keys[2], (1, ns), dtype=jnp.float32)
    w2 = 0.1 * jax.random.normal(keys[3], (ns, C), dtype=jnp.float32)
    b2 = 0.1 * jax.random.normal(keys[4], (1, C), dtype=jnp.float32)

    ref = squeeze_excite_ref(x, w1, b1, w2, b2)
    out = jax.block_until_ready(squeeze_excite(x, w1, b1, w2, b2))
    assert out.shape == x.shape and out.dtype == x.dtype
    assert jnp.allclose(out, ref, atol=1e-5, rtol=1e-5), "resident path mismatch"

    # --- Test 2: force the large-activation fallback (pool/scale + tiled gate)
    out_fb = jax.block_until_ready(
        squeeze_excite(x, w1, b1, w2, b2, target_tile_bytes=1 << 10, force_two_pass=True))
    assert jnp.allclose(out_fb, ref, atol=1e-5, rtol=1e-5), "two-pass fallback mismatch"

    # --- Test 3: late-stage SE shape (C >= HW) -> channels-last lane layout --
    N2, C2, H2, W2, ns2 = 2, 256, 4, 4, 16
    x_b = jax.random.normal(keys[5], (N2, C2, H2, W2), dtype=jnp.float32)
    w1_b = 0.1 * jax.random.normal(keys[6], (C2, ns2), dtype=jnp.float32)
    b1_b = 0.1 * jax.random.normal(keys[7], (1, ns2), dtype=jnp.float32)
    w2_b = 0.1 * jax.random.normal(keys[8], (ns2, C2), dtype=jnp.float32)
    b2_b = 0.1 * jax.random.normal(keys[9], (1, C2), dtype=jnp.float32)
    out_b = jax.block_until_ready(squeeze_excite(x_b, w1_b, b1_b, w2_b, b2_b))
    ref_b = squeeze_excite_ref(x_b, w1_b, b1_b, w2_b, b2_b)
    assert jnp.allclose(out_b, ref_b, atol=1e-5, rtol=1e-5), "channels-last path mismatch"

    print("KERNEL_OK")
</pallas_src>

<mosaic_0001>
module attributes {stable_mosaic.version = 11 : i64} {
  func.func @_se_resident_kernel(%arg0: i32, %arg1: memref<1x4x256xf32, #tpu.memory_space<vmem>>, %arg2: memref<4x2xf32, #tpu.memory_space<vmem>>, %arg3: memref<1x2xf32, #tpu.memory_space<vmem>>, %arg4: memref<2x4xf32, #tpu.memory_space<vmem>>, %arg5: memref<1x4xf32, #tpu.memory_space<vmem>>, %arg6: memref<1x4x256xf32, #tpu.memory_space<vmem>>) attributes {dimension_semantics = [#tpu.dimension_semantics<parallel>], iteration_bounds = array<i64: 2>, scalar_prefetch = 0 : i64, scratch_operands = 0 : i64, tpu.core_type = #tpu.core_type<tc>, window_params = [{transform_indices = @transform_0, window_bounds = array<i64: 1, 4, 256>}, {pipeline_mode = #tpu.pipeline_mode<synchronous>, transform_indices = @transform_1, window_bounds = array<i64: 4, 2>}, {pipeline_mode = #tpu.pipeline_mode<synchronous>, transform_indices = @transform_2, window_bounds = array<i64: 1, 2>}, {pipeline_mode = #tpu.pipeline_mode<synchronous>, transform_indices = @transform_3, window_bounds = array<i64: 2, 4>}, {pipeline_mode = #tpu.pipeline_mode<synchronous>, transform_indices = @transform_4, window_bounds = array<i64: 1, 4>}, {transform_indices = @transform_5, window_bounds = array<i64: 1, 4, 256>}]} {
    %c0 = arith.constant 0 : index
    %c0_0 = arith.constant 0 : index
    %c0_1 = arith.constant 0 : index
    %0 = vector.load %arg1[%c0, %c0_0, %c0_1] : memref<1x4x256xf32, #tpu.memory_space<vmem>>, vector<1x4x256xf32>
    %cst = arith.constant dense<0.000000e+00> : vector<1x4xf32>
    %1 = vector.multi_reduction <add>, %0, %cst [2] : vector<1x4x256xf32> to vector<1x4xf32>
    %cst_2 = arith.constant 2.560000e+02 : f32
    %2 = vector.broadcast %cst_2 : f32 to vector<1x4xf32>
    %3 = arith.divf %1, %2 : vector<1x4xf32>
    %c0_3 = arith.constant 0 : index
    %c0_4 = arith.constant 0 : index
    %4 = vector.load %arg2[%c0_3, %c0_4] : memref<4x2xf32, #tpu.memory_space<vmem>>, vector<4x2xf32>
    %cst_5 = arith.constant dense<0.000000e+00> : vector<1x2xf32>
    %5 = tpu.matmul %3, %4, %cst_5 {dimension_numbers = #tpu.dot_dimension_numbers<[1], [0], [0], [1], [0, 0, 1, 1], [], []>} : vector<1x4xf32>, vector<4x2xf32>, vector<1x2xf32> -> vector<1x2xf32>
    %c0_6 = arith.constant 0 : index
    %c0_7 = arith.constant 0 : index
    %6 = vector.load %arg3[%c0_6, %c0_7] : memref<1x2xf32, #tpu.memory_space<vmem>>, vector<1x2xf32>
    %7 = arith.addf %5, %6 : vector<1x2xf32>
    %8 = arith.negf %7 : vector<1x2xf32>
    %9 = math.exp %8 : vector<1x2xf32>
    %cst_8 = arith.constant 1.000000e+00 : f32
    %10 = vector.broadcast %cst_8 : f32 to vector<1x2xf32>
    %11 = arith.addf %10, %9 : vector<1x2xf32>
    %12 = arith.divf %10, %11 : vector<1x2xf32>
    %13 = arith.mulf %7, %12 : vector<1x2xf32>
    %c0_9 = arith.constant 0 : index
    %c0_10 = arith.constant 0 : index
    %14 = vector.load %arg4[%c0_9, %c0_10] : memref<2x4xf32, #tpu.memory_space<vmem>>, vector<2x4xf32>
    %cst_11 = arith.constant dense<0.000000e+00> : vector<1x4xf32>
    %15 = tpu.matmul %13, %14, %cst_11 {dimension_numbers = #tpu.dot_dimension_numbers<[1], [0], [0], [1], [0, 0, 1, 1], [], []>} : vector<1x2xf32>, vector<2x4xf32>, vector<1x4xf32> -> vector<1x4xf32>
    %c0_12 = arith.constant 0 : index
    %c0_13 = arith.constant 0 : index
    %16 = vector.load %arg5[%c0_12, %c0_13] : memref<1x4xf32, #tpu.memory_space<vmem>>, vector<1x4xf32>
    %17 = arith.addf %15, %16 : vector<1x4xf32>
    %18 = arith.negf %17 : vector<1x4xf32>
    %19 = math.exp %18 : vector<1x4xf32>
    %cst_14 = arith.constant 1.000000e+00 : f32
    %20 = vector.broadcast %cst_14 : f32 to vector<1x4xf32>
    %21 = arith.addf %20, %19 : vector<1x4xf32>
    %22 = arith.divf %20, %21 : vector<1x4xf32>
    %23 = vector.shape_cast %22 : vector<1x4xf32> to vector<1x4x1xf32>
    %24 = vector.broadcast %23 : vector<1x4x1xf32> to vector<1x4x256xf32>
    %25 = arith.mulf %0, %24 : vector<1x4x256xf32>
    %c0_15 = arith.constant 0 : index
    %c0_16 = arith.constant 0 : index
    %c0_17 = arith.constant 0 : index
    %26 = vector.load %arg6[%c0_15, %c0_16, %c0_17] : memref<1x4x256xf32, #tpu.memory_space<vmem>>, vector<1x4x256xf32>
    tpu.vector_store %arg6[%c0_15, %c0_16, %c0_17], %25 {strides = array<i32>} : memref<1x4x256xf32, #tpu.memory_space<vmem>>, vector<1x4x256xf32>,
    return
  }
  func.func @transform_0(%arg0: i32) -> (i32, i32, i32) {
    %c0_i32 = arith.constant 0 : i32
    %c0_i32_0 = arith.constant 0 : i32
    %c0_i32_1 = arith.constant 0 : i32
    return %arg0, %c0_i32, %c0_i32_0 : i32, i32, i32
  }
  func.func @transform_1(%arg0: i32) -> (i32, i32) {
    %c0_i32 = arith.constant 0 : i32
    %c0_i32_0 = arith.constant 0 : i32
    %c0_i32_1 = arith.constant 0 : i32
    return %c0_i32, %c0_i32_0 : i32, i32
  }
  func.func @transform_2(%arg0: i32) -> (i32, i32) {
    %c0_i32 = arith.constant 0 : i32
    %c0_i32_0 = arith.constant 0 : i32
    %c0_i32_1 = arith.constant 0 : i32
    return %c0_i32, %c0_i32_0 : i32, i32
  }
  func.func @transform_3(%arg0: i32) -> (i32, i32) {
    %c0_i32 = arith.constant 0 : i32
    %c0_i32_0 = arith.constant 0 : i32
    %c0_i32_1 = arith.constant 0 : i32
    return %c0_i32, %c0_i32_0 : i32, i32
  }
  func.func @transform_4(%arg0: i32) -> (i32, i32) {
    %c0_i32 = arith.constant 0 : i32
    %c0_i32_0 = arith.constant 0 : i32
    %c0_i32_1 = arith.constant 0 : i32
    return %c0_i32, %c0_i32_0 : i32, i32
  }
  func.func @transform_5(%arg0: i32) -> (i32, i32, i32) {
    %c0_i32 = arith.constant 0 : i32
    %c0_i32_0 = arith.constant 0 : i32
    %c0_i32_1 = arith.constant 0 : i32
    return %arg0, %c0_i32, %c0_i32_0 : i32, i32, i32
  }
}

</mosaic_0001>

<bundles_post_ra>
// kernel: tpu_custom_call.1
= control target key start
LH: loop header
LB: loop body
LE: loop exit
PB: predicated region body
PF: predicated region fallthrough
CT: control target
= control target key end

     0   :  { %10 = vsyncpa [#allocation3], 0  ;;  %s938_s0 = inlined_call_operand.hbm [shape: f32[2,4,256], index: 0, kind: input, shape index: {}]   ;;  %s939_s1 = inlined_call_operand.vmem [shape: f32[4,2], index: 1, kind: input, shape index: {}]   ;;  %s940_s2 = inlined_call_operand.vmem [shape: f32[1,2], index: 2, kind: input, shape index: {}]   ;;  %s941_s3 = inlined_call_operand.vmem [shape: f32[2,4], index: 3, kind: input, shape index: {}]   ;;  %s942_s4 = inlined_call_operand.vmem [shape: f32[1,4], index: 4, kind: input, shape index: {}]   ;;  %s943_s5 = inlined_call_operand.hbm [shape: f32[2,4,256], index: 5, kind: output, shape index: {}]  }
   0x1   :  { %12 = vsyncpa [#allocation3 + $0x1], 0 }
   0x2   :  { %13 = vsyncpa [#allocation4], 0 }
   0x3   :  { %15 = vsyncpa [#allocation4 + $0x1], 0  ;;  %s761_s18 = smov 0   ;;  %s763_s19 = smov 0  }
   0x4   :  { %s765_s20 = smov 0   ;;  %s767_s21 = smov 0  }
   0x5 LB: > { %s782_s22 = sadd.s32 4294967295, %s724_s21   ;;  %s534_s23 = sadd.s32 4294967294, %s724_s21   ;;  %s724_s21 = sphi %s767_s21, %s958_s21   ;;  %s720_s20 = sphi %s765_s20, %s957_s20   ;;  %s716_s19 = sphi %s763_s19, %s956_s19   ;;  %s712_s18 = sphi %s761_s18, %s955_s18  }
   0x6   : > { %s786_s24 = sadd.s32 1, %s724_s21   ;;  %s28_s25 = sadd.s32 1, %s720_s20 }
   0x7   : > { %s25_s26 = ssub.s32 %s724_s21, %s786_s24  ;;  %p35_p0 = scmp.ne.s32.totalorder %s720_s20, %s716_s19 }
   0x8   : > { %p26_p1 = scmp.eq.s32.totalorder %s25_s26, 0  ;;  %p36_p2 = scmp.eq.s32.totalorder %s724_s21, 0 }
   0x9   : > { %p41_p3 = scmp.ne.s32.totalorder %s716_s19, %s712_s18  ;;  %p42_p4 = scmp.eq.s32.totalorder %s782_s22, 0 }
   0xa   : > { %s798_s27 = scalar_select %p26_p1, %s720_s20, %s28_s25  }
   0xb   : > { %p800_p5 = por %p36_p2, %p35_p0  ;;  %p804_p6 = por %p42_p4, %p41_p3 }
   0xc   : > { %p149_p7 = scmp.eq.s32.totalorder %s782_s22, 1  ;;  %p155_p8 = scmp.eq.s32.totalorder %s534_s23, 1 }
   0xd   : > { %p582_p10 = scmp.lt.s32.totalorder %s724_s21, 2  ;;  %s187_s7 = sand.u32 1, %s720_s20  }
   0xe   : > { %p811_p11 = por %p149_p7, %p35_p0  ;;  %p815_p12 = por %p155_p8, %p41_p3 }
   0xf   : > { %s554_s8 = sshll.u32 %s724_s21, 7  ;;  %s537_s9 = sshll.u32 %s187_s7, 3 }
  0x10   : > { %s947_s30 = scalar_select %p811_p11, 1, 0 }
  0x11   : > { %s948_s6 = scalar_select %p815_p12, 1, 0 }
  0x12   : > { %s824_s12 = scalar_lea.hbm %s938_s0, %s554_s8  ;;  %s191_s13 = scalar_lea.vmem [#allocation2], %s537_s9 }
  0x13   : > { %s199_s14 = sshll.u32 %s191_s13, 4  ;;  %p828_p13 = pnand %p582_p10, %p800_p5  ;;  %s832_s14 = int_to_ptr.vmem [resolvable:$true] %s199_s14 }
  0x14   : > { %s188_s16 = scalar_lea.sflag [#allocation3], %s187_s7  ;;  %s628_s17 = scalar_lea.hbm %s824_s12, 128 }
  0x15   : > { %p629_p2 = scmp.ne.s32.totalorder %s824_s12, %s628_s17  ;;  %p630_p3 = pneg %p828_p13 }
  0x16   : > { %s633_s26 = scalar_lea.hbm %s938_s0, 256  ;;  %p634_p5 = scmp.lt.u32.totalorder %s824_s12, %s938_s0 }
  0x17   : > { %p631_p4 = pnand %p630_p3, %p629_p2  ;;  %p635_p8 = scmp.lt.u32.totalorder %s633_s26, %s628_s17 }
  0x18   : > { %p637_p9 = scmp.lt.u32.totalorder %s628_s17, %s824_s12 }
  0x19   : > { %p632_p7 = pneg %p631_p4  ;;  %p636_p10 = por %p635_p8, %p634_p5 }
  0x1b   : > { %p638_p0 = por %p637_p9, %p636_p10 }
  0x1d   : > { %p639_p1 = pnand %p638_p0, %p632_p7 }
  0x1f   : > { %642 = shalt.err (!%p639_p1)
}
  0x20   : > { %s643_s7 = scalar_lea.vmem %s832_s14, 128  ;;  %s726_s9 = smov [#allocation2]  }
  0x21   : > { %p644_p2 = scmp.ne.s32.totalorder %s832_s14, %s643_s7  ;;  %s648_s10 = sshll.u32 %s726_s9, 4  ;;  %s649_s10 = int_to_ptr.vmem [resolvable:$false] %s648_s10 }
  0x22   : > { %s650_s11 = scalar_lea.vmem %s649_s10, 256  ;;  %p651_p11 = scmp.lt.s32.totalorder %s832_s14, %s649_s10 }
  0x23   : > { %p646_p4 = pnand %p644_p2, %p630_p3  ;;  %p652_p5 = scmp.lt.s32.totalorder %s650_s11, %s643_s7 }
  0x25   : > { %p647_p12 = pneg %p646_p4  ;;  %p653_p8 = por %p652_p5, %p651_p11 }
  0x27   : > { %p654_p9 = pnand %p653_p8, %p647_p12 }
  0x29   : > { %657 = shalt.err (!%p654_p9)
}
  0x2a   : > { %577 = dma.hbm_to_vmem [thread:$0]  (!%p828_p13), %s824_s12, 128, %s832_s14, %s188_s16  }
  0x2b   : > { %p950_p0 = scmp.lt.s32.totalorder %s724_s21, 3  ;;  %p951_p1 = scmp.ge.s32.totalorder %s724_s21, 1 }
  0x2d   : > { %p205_p3 = pnand %p951_p1, %p950_p0 }
  0x2e   : > { %s866_s13 = sand.u32 (!%p205_p3), 1, %s716_s19  }
  0x2f   : > { %208 = sbr.rel (%p205_p3) target bundleno = 824 (0x338), region = 40  ;;  %s541_s17 = sshll.u32 (!%p205_p3), %s866_s13, 3 }
  0x30   : > { %s211_s23 = scalar_lea.sflag (!%p205_p3), [#allocation3], %s866_s13  ;;  %s214_s15 = scalar_lea.vmem (!%p205_p3), [#allocation2], %s541_s17 }
  0x36   : > { %703 = dma.done.wait (%p804_p6), %s211_s23, 128  }
  0x37   : > { %705 = vsyncadd (%p804_p6), %s211_s23, 4294967168  ;;  %vm245_vm0 = vcmask 1043456   ;;  %v241_v0 = vld [vmem:[%s214_s15] sm:$0xff]  ;;  %v727_v5 = vmov 0.0   ;;  %vm728_vm1 = vmmov 0   ;;  %v256_v7 = vlaneseq  ;;  %s555_s7 = sshll.u32 %s782_s22, 7 }
  0x38   : > { %v243_v1 = vcombine.high %v241_v0, %v241_v0  ;;  %v246_v2 = vsel %vm245_vm0, %v241_v0, 0.0  ;;  %560 = vmatprep.subr.mxu0 %v727_v5  ;;  %v253_v6 = vld [vmem:[%s939_s1] sm:$0xf]  ;;  %565 = vmatprep.subr.mxu1 %v727_v5  ;;  %vm262_vm2 = vcmask 31744   ;;  %vm351_vm3 = vcmask 1041408   ;;  %s240_s9 = scalar_lea.vmem [#allocation5], %s541_s17  ;;  %s894_s15 = scalar_lea.hbm %s943_s5, %s555_s7 }
  0x39   : > { %561 = vmatpush3.msk.msra.mxu0 %vm245_vm0, %v253_v6  ;;  %562 = vmatprep.mubr.msk.f32.mxu0 %vm728_vm1, %v727_v5  ;;  %v257_v8 = vand.u32 127, %v256_v7  ;;  %v259_v9 = vshrl.u32 %v256_v7, 7  ;;  %v345_v14 = vld [vmem:[%s941_s3] sm:$0x3]  ;;  %vm347_vm4 = vcmask 15360   ;;  %s464_s10 = sshll.u32 %s240_s9, 4  ;;  %s896_s10 = int_to_ptr.vmem [resolvable:$true] %s464_s10 }
  0x3a   : > { %v247_v3 = vsel %vm245_vm0, %v243_v1, 0.0  ;;  %567 = vmatprep.mubr.msk.f32.mxu1 %vm728_vm1, %v727_v5  ;;  %566 = vmatpush3.msk.msra.mxu1 %vm351_vm3, %v345_v14  ;;  %v254_v15 = vld [vmem:[%s940_s2] sm:$0x1]  ;;  %v729_v34 = vmov 839922192   ;;  %s450_s12 = scalar_lea.sflag [#allocation4], %s866_s13 }
  0x3b   : > { %v248_v4 = vadd.f32 %v247_v3, %v246_v2  ;;  %v260_v10 = vsub.s32 %v257_v8, %v259_v9  ;;  %v346_v24 = vld [vmem:[%s942_s4] sm:$0x1]  ;;  %v433_v31 = vsub.s32 0, %v259_v9  ;;  %v440_v35 = vunpack.c.l.s4 %v729_v34  ;;  %s658_s14 = scalar_lea.vmem %s896_s10, 128  ;;  %p952_p11 = scmp.ne.s32.totalorder %s947_s30, 0 }
  0x3c   : > { %p659_p6 = scmp.ne.s32.totalorder %s896_s10, %s658_s14  ;;  %s730_s22 = smov [#allocation5]  }
  0x3d   : > { %249 = vadd.xlane.f32.xlu0 %v248_v4  ;;  %v441_v36 = vunpack.c.0.s8 %v440_v35  ;;  %s662_s17 = sshll.u32 %s730_s22, 4  ;;  %s663_s17 = int_to_ptr.vmem [resolvable:$false] %s662_s17 }
  0x3e   : > { %p660_p12 = pnand %p659_p6, %p952_p11  ;;  %s664_s29 = scalar_lea.vmem %s663_s17, 256 }
  0x3f   : > { %v444_v37 = vsub.s32 %v441_v36, %v259_v9  ;;  %p665_p7 = scmp.lt.s32.totalorder %s896_s10, %s663_s17  ;;  %p666_p10 = scmp.lt.s32.totalorder %s664_s29, %s658_s14 }
  0x40   : > { %p661_p13 = pneg %p660_p12 }
  0x41   : > { %p667_p2 = por %p666_p10, %p665_p7 }
  0x43   : > { %p668_p4 = pnand %p667_p2, %p661_p13 }
  0xca   : > { %v250_v11 = vpop.xlane.xlu0 %249 }
  0xcb   : > { %v252_v12 = vmul.f32 0.00390625, %v250_v11 }
  0xcd   : > { %v261_v13 = vrot.slane %v252_v12, %v260_v10 }
  0xcf   : > { %563 = vmatmul.mubr.msk.f32.vlgmr.msra.gmra.mrb[0].mxu0 %vm262_vm2, %v261_v13 }
 0x1a2   : > { %v334_v16 = vpop.f32.mrb[0].mxu0 }
 0x1a3   : > { %v335_v17 = vadd.f32 %v334_v16, %v254_v15  ;;  %v564_v18 = vpop.f32.mrb[1].mxu0 }
 0x1a5   : > { %v545_v19 = vmul.f32 -1.442695, %v335_v17 }
 0x1a7   : > { %620 = vpow2.f32 %v545_v19 }
 0x1b1   : > { %v621_v20 = vpop.eup %620 }
 0x1b2   : > { %v341_v21 = vadd.f32 1.0, %v621_v20 }
 0x1b4   : > { %622 = vrcp.f32 %v341_v21 }
 0x1be   : > { %v623_v22 = vpop.eup %622 }
 0x1bf   : > { %v344_v23 = vmul.f32 %v623_v22, %v335_v17 }
 0x1c1   : > { %568 = vmatmul.mubr.msk.f32.vlgmr.msra.gmra.mrb[0].mxu1 %vm347_vm4, %v344_v23 }
 0x294   : > { %v421_v25 = vpop.f32.mrb[0].mxu1 }
 0x295   : > { %v422_v26 = vadd.f32 %v421_v25, %v346_v24  ;;  %v569_v27 = vpop.f32.mrb[1].mxu1 }
 0x297   : > { %v548_v28 = vmul.f32 -1.442695, %v422_v26 }
 0x299   : > { %624 = vpow2.f32 %v548_v28 }
 0x2a3   : > { %v625_v29 = vpop.eup %624 }
 0x2a4   : > { %v428_v30 = vadd.f32 1.0, %v625_v29 }
 0x2a6   : > { %626 = vrcp.f32 %v428_v30 }
 0x2b0   : > { %v627_v32 = vpop.eup %626 }
 0x2b1   : > { %v434_v33 = vrot.slane %v627_v32, %v433_v31 }
 0x2b3   : > { %436 = vbcast.lane.b32.xlu0 %v434_v33, 256 }
 0x325   : > { %v437_v38 = vpop.permute.xlu0 %436 }
 0x326   : > { %v445_v39 = vrot.slane %v437_v38, %v444_v37 }
 0x328   : > { %v447_v40 = vmul.f32 %v445_v39, %v241_v0 }
 0x32a   : > { %448 = vst [vmem:[%s240_s9] sm:$0xff] %v447_v40 }
 0x32b   : > { %671 = shalt.err (!%p668_p4)
}
 0x32c   : > { %s672_s13 = scalar_lea.hbm %s894_s15, 128  ;;  %s676_s26 = scalar_lea.hbm %s943_s5, 256 }
 0x32d   : > { %p673_p5 = scmp.ne.s32.totalorder %s894_s15, %s672_s13  ;;  %p677_p0 = scmp.lt.u32.totalorder %s894_s15, %s943_s5 }
 0x32e   : > { %p678_p1 = scmp.lt.u32.totalorder %s676_s26, %s672_s13  ;;  %p680_p6 = scmp.lt.u32.totalorder %s672_s13, %s894_s15 }
 0x32f   : > { %p674_p8 = pnand %p673_p5, %p952_p11 }
 0x330   : > { %p679_p3 = por %p678_p1, %p677_p0 }
 0x331   : > { %p675_p9 = pneg %p674_p8 }
 0x332   : > { %p681_p12 = por %p680_p6, %p679_p3 }
 0x334   : > { %p682_p13 = pnand %p681_p12, %p675_p9 }
 0x336   : > { %685 = shalt.err (!%p682_p13)
}
 0x337   : > { %572 = dma.vmem_to_hbm [thread:$0]  (%p952_p11), %s896_s10, 128, %s894_s15, %s450_s12  }
 0x338 PF: > { %s476_s7 = sand.u32 1, %s712_s18   ;;  %p953_p7 = scmp.ne.s32.totalorder %s948_s6, 0 }
 0x339   : > { %p954_p10 = scmp.ge.s32.totalorder %s724_s21, 2  ;;  %s477_s9 = scalar_lea.sflag [#allocation4], %s476_s7 }
 0x33b   : > { %p579_p2 = pnand %p954_p10, %p953_p7 }
 0x33d   : > { %707 = dma.done.wait (!%p579_p2), %s477_s9, 128  }
 0x33e   : > { %709 = vsyncadd (!%p579_p2), %s477_s9, 4294967168  ;;  %p18_p4 = scmp.ge.s32.totalorder %s786_s24, 4   ;;  %s955_s18 = smov %s716_s19 }
 0x33f   : > { %s956_s19 = smov %s720_s20  ;;  %s957_s20 = smov %s798_s27 }
 0x340   : > { %s958_s21 = smov %s786_s24  ;;  %20 = sbr.rel (!%p18_p4) target bundleno = 5 (0x5), region = 85 }
 0x347   :  { %482 = vsyncpa [#allocation3], 1 }
 0x348   :  { %484 = vsyncpa [#allocation3 + $0x1], 1 }
 0x349   :  { %485 = vsyncpa [#allocation4], 1 }
 0x34a   :  { %487 = vsyncpa [#allocation4 + $0x1], 1 }

</bundles_post_ra>
